<compile_context>
chip_gen: v6e
topology: v6e:2x2x1
jax: 0.10.0
libtpu: 0.0.40
codegen_flags: <defaults>
</compile_context>

<pallas_src>
import functools

import jax
import jax.numpy as jnp
import numpy as np
from jax.experimental import pallas as pl
from jax.experimental.pallas import tpu as pltpu

CLIP = 5.0
EPS = 1e-8
# Batch-tile cap (sweep parameter).  4096 keeps per-step VMEM (double-buffered
# (tile_b, D) input, lane-padded, plus f32 temporaries) around ~10 MiB — inside
# even v5e's 16 MiB default scoped-VMEM limit.  If raised past ~8K, also set
# pltpu.CompilerParams(vmem_limit_bytes=...).
TILE_B_CAP = 4096


def _round_up(a, m):
    return ((a + m - 1) // m) * m


def _choose_tile_b(batch, cap=TILE_B_CAP):
    """Adaptive batch tile: multiple of 128 lanes; >=2 grid steps when the
    batch is large enough (so v7x's two TensorCores both get work)."""
    b128 = _round_up(max(int(batch), 1), 128)
    if b128 <= 128:
        return 128
    half = _round_up((b128 + 1) // 2, 128)  # aim for (at least) 2 tiles
    return int(min(cap, half))


# ----------------------------------------------------------------------------
# Kernel
# ----------------------------------------------------------------------------
def critic_kernel(x_ref, mean_ref, inv_std_ref,
                  w1t_ref, b1_ref, w2t_ref, b2_ref,
                  wv_ref, bv_ref, out_ref):
    # x_ref: (tile_b, D) row-major batch tile (one contiguous DMA from HBM).
    # --- RunningNorm (eval mode: fixed mean / precomputed inv_std) + clip ---
    xn = (x_ref[...] - mean_ref[...]) * inv_std_ref[...]
    xn = jnp.clip(xn, -CLIP, CLIP)

    # --- layer 1: contract the feature axis of both operands -> (h1, tile_b).
    # Batch lands on the 128-wide lane axis; the (tile_b, D) -> (D, tile_b)
    # reorientation is done in-kernel on the XLU/MXU (no host transpose).
    h = jax.lax.dot_general(
        w1t_ref[...], xn,
        dimension_numbers=(((1,), (1,)), ((), ())),
        preferred_element_type=jnp.float32)
    h = jnp.tanh(h + b1_ref[...])

    # --- layer 2: (h2, h1) @ (h1, tile_b) -> (h2, tile_b) ---
    h = jnp.tanh(jnp.dot(w2t_ref[...], h,
                         preferred_element_type=jnp.float32) + b2_ref[...])

    # --- value head: per-batch dot over hidden dim (mul + sublane reduce).
    # Produces a lane-dense (1, tile_b) row -> unmasked stores.
    v = jnp.sum(h * wv_ref[...], axis=0, keepdims=True) + bv_ref[...]
    out_ref[0] = v  # out block is (1, 1, tile_b)


# ----------------------------------------------------------------------------
# Host-side parameter preparation (layout plumbing, done once)
# ----------------------------------------------------------------------------
def prepare_params(p):
    """Re-layout PyTorch-style params for the kernel (transposed weights,
    precomputed inv_std)."""
    return dict(
        mean=p["norm_mean"].astype(jnp.float32),                    # (1, D)
        inv_std=(1.0 / (p["norm_std"] + EPS)).astype(jnp.float32),  # (1, D)
        w1t=p["w1"].T.astype(jnp.float32),                          # (h1, D)
        b1=p["b1"].T.astype(jnp.float32),                           # (h1, 1)
        w2t=p["w2"].T.astype(jnp.float32),                          # (h2, h1)
        b2=p["b2"].T.astype(jnp.float32),                           # (h2, 1)
        wv=p["wv"].astype(jnp.float32),                             # (h2, 1)
        bv=p["bv"].astype(jnp.float32),                             # (1, 1)
    )


# ----------------------------------------------------------------------------
# Wrapper
# ----------------------------------------------------------------------------
def evo_bipedalwalker_value(x, kp, tile_cap=TILE_B_CAP):
    """x: (B, state_dim) float32; kp: output of prepare_params."""
    B, D = x.shape
    h1 = kp["w1t"].shape[0]
    h2 = kp["w2t"].shape[0]

    tile_b = _choose_tile_b(B, tile_cap)
    num_tiles = -(-B // tile_b)
    b_pad = num_tiles * tile_b

    x = x.astype(jnp.float32)
    if b_pad != B:
        # Single cheap pad of the batch dim only (no feature pad, no transpose).
        x = jnp.pad(x, ((0, b_pad - B), (0, 0)))

    flops = 2 * b_pad * (D * h1 + h1 * h2 + h2)
    transcendentals = b_pad * (h1 + h2)
    bytes_accessed = 4 * (b_pad * D + b_pad + 2 * D
                          + D * h1 + h1 + h1 * h2 + h2 + h2 + 1)

    def resident(a):
        # Full-array block with a constant index_map: DMA'd once, stays
        # resident in VMEM across all grid steps.
        return pl.BlockSpec(a.shape, lambda i: (0,) * a.ndim)

    out = pl.pallas_call(
        critic_kernel,
        out_shape=jax.ShapeDtypeStruct((num_tiles, 1, tile_b), jnp.float32),
        grid=(num_tiles,),
        in_specs=[
            pl.BlockSpec((tile_b, D), lambda i: (i, 0)),  # contiguous row tiles
            resident(kp["mean"]),
            resident(kp["inv_std"]),
            resident(kp["w1t"]),
            resident(kp["b1"]),
            resident(kp["w2t"]),
            resident(kp["b2"]),
            resident(kp["wv"]),
            resident(kp["bv"]),
        ],
        out_specs=pl.BlockSpec((1, 1, tile_b), lambda i: (i, 0, 0)),
        compiler_params=pltpu.CompilerParams(
            dimension_semantics=("parallel",)),
        cost_estimate=pl.CostEstimate(
            flops=flops,
            transcendentals=transcendentals,
            bytes_accessed=bytes_accessed),
    )(x, kp["mean"], kp["inv_std"], kp["w1t"], kp["b1"],
      kp["w2t"], kp["b2"], kp["wv"], kp["bv"])

    # (num_tiles, 1, tile_b) -> (B, 1), dropping batch padding.
    return out.reshape(b_pad)[:B].reshape(B, 1)


# ----------------------------------------------------------------------------
# Synthetic parameters matching the module's shapes (PyTorch layout)
# ----------------------------------------------------------------------------
def init_params(key, state_dim, hidden_dims):
    ks = jax.random.split(key, 8)
    h1, h2 = hidden_dims

    def uniform(k, shape, fan_in):
        bound = 1.0 / np.sqrt(fan_in)
        return jax.random.uniform(k, shape, jnp.float32, -bound, bound)

    params = {
        # RunningNorm buffers (eval mode). Non-trivial values so the
        # normalization path is exercised.
        "norm_mean": jax.random.normal(ks[0], (1, state_dim), jnp.float32) * 0.1,
        "norm_std": jnp.abs(jax.random.normal(ks[1], (1, state_dim),
                                              jnp.float32)) + 0.5,
        # MLP layer 1
        "w1": uniform(ks[2], (state_dim, h1), state_dim),
        "b1": uniform(ks[3], (1, h1), state_dim),
        # MLP layer 2
        "w2": uniform(ks[4], (h1, h2), h1),
        "b2": uniform(ks[5], (1, h2), h1),
        # value head: weight *= 0.1, bias *= 0.0 (as in __init__)
        "wv": uniform(ks[6], (h2, 1), h2) * 0.1,
        "bv": jnp.zeros((1, 1), jnp.float32),
    }
    return params


def reference_forward(x, p):
    xn = jnp.clip((x - p["norm_mean"]) / (p["norm_std"] + EPS), -CLIP, CLIP)
    h = jnp.tanh(xn @ p["w1"] + p["b1"])
    h = jnp.tanh(h @ p["w2"] + p["b2"])
    return h @ p["wv"] + p["bv"]


# TODO(synk): RunningNorm training-mode statistics update and the python-list
# batch_data() unpacking are host-side / stateful and are not part of this
# eval-mode forward kernel.

if __name__ == "__main__":
    key = jax.random.PRNGKey(0)
    k_stage, k_scale, k_obs, k_par = jax.random.split(key, 4)

    # Small shapes consistent with the module: stage one-hot (2),
    # scale_state_dim = 4, sim_obs_dim = 24  ->  state_dim = 30.
    B = 8
    stage_dim, scale_state_dim, sim_obs_dim = 2, 4, 24
    state_dim = stage_dim + scale_state_dim + sim_obs_dim
    hidden_dims = (64, 64)  # cfg.value_spec['mlp'], htype = 'tanh'

    stage_ind = jax.nn.one_hot(
        jax.random.randint(k_stage, (B,), 0, stage_dim), stage_dim,
        dtype=jnp.float32)
    scale_state = jax.random.normal(k_scale, (B, scale_state_dim), jnp.float32)
    sim_obs = jax.random.normal(k_obs, (B, sim_obs_dim), jnp.float32)

    # batch_data + cat happens in plain JAX (glue).
    x = jnp.concatenate([stage_ind, scale_state, sim_obs], axis=-1)

    params = init_params(k_par, state_dim, hidden_dims)
    kparams = jax.tree_util.tree_map(jax.block_until_ready,
                                     prepare_params(params))

    value_fn = jax.jit(functools.partial(evo_bipedalwalker_value, kp=kparams))
    value = jax.block_until_ready(value_fn(x))
    ref = reference_forward(x, params)

    assert value.shape == (B, 1)
    np.testing.assert_allclose(np.asarray(value), np.asarray(ref),
                               rtol=1e-4, atol=1e-5)
    print("KERNEL_OK")
</pallas_src>

<mosaic_0001>
module attributes {stable_mosaic.version = 11 : i64} {
  func.func @critic_kernel(%arg0: i32, %arg1: memref<128x30xf32, #tpu.memory_space<vmem>>, %arg2: memref<1x30xf32, #tpu.memory_space<vmem>>, %arg3: memref<1x30xf32, #tpu.memory_space<vmem>>, %arg4: memref<64x30xf32, #tpu.memory_space<vmem>>, %arg5: memref<64x1xf32, #tpu.memory_space<vmem>>, %arg6: memref<64x64xf32, #tpu.memory_space<vmem>>, %arg7: memref<64x1xf32, #tpu.memory_space<vmem>>, %arg8: memref<64x1xf32, #tpu.memory_space<vmem>>, %arg9: memref<1x1xf32, #tpu.memory_space<vmem>>, %arg10: memref<1x1x128xf32, #tpu.memory_space<vmem>>) attributes {dimension_semantics = [#tpu.dimension_semantics<parallel>], iteration_bounds = array<i64: 1>, scalar_prefetch = 0 : i64, scratch_operands = 0 : i64, tpu.core_type = #tpu.core_type<tc>, window_params = [{transform_indices = @transform_0, window_bounds = array<i64: 128, 30>}, {pipeline_mode = #tpu.pipeline_mode<synchronous>, transform_indices = @transform_1, window_bounds = array<i64: 1, 30>}, {pipeline_mode = #tpu.pipeline_mode<synchronous>, transform_indices = @transform_2, window_bounds = array<i64: 1, 30>}, {pipeline_mode = #tpu.pipeline_mode<synchronous>, transform_indices = @transform_3, window_bounds = array<i64: 64, 30>}, {pipeline_mode = #tpu.pipeline_mode<synchronous>, transform_indices = @transform_4, window_bounds = array<i64: 64, 1>}, {pipeline_mode = #tpu.pipeline_mode<synchronous>, transform_indices = @transform_5, window_bounds = array<i64: 64, 64>}, {pipeline_mode = #tpu.pipeline_mode<synchronous>, transform_indices = @transform_6, window_bounds = array<i64: 64, 1>}, {pipeline_mode = #tpu.pipeline_mode<synchronous>, transform_indices = @transform_7, window_bounds = array<i64: 64, 1>}, {pipeline_mode = #tpu.pipeline_mode<synchronous>, transform_indices = @transform_8, window_bounds = array<i64: 1, 1>}, {transform_indices = @transform_9, window_bounds = array<i64: 1, 1, 128>}]} {
    %c0 = arith.constant 0 : index
    %c0_0 = arith.constant 0 : index
    %0 = vector.load %arg1[%c0, %c0_0] : memref<128x30xf32, #tpu.memory_space<vmem>>, vector<128x30xf32>
    %c0_1 = arith.constant 0 : index
    %c0_2 = arith.constant 0 : index
    %1 = vector.load %arg2[%c0_1, %c0_2] : memref<1x30xf32, #tpu.memory_space<vmem>>, vector<1x30xf32>
    %2 = vector.broadcast %1 : vector<1x30xf32> to vector<128x30xf32>
    %3 = arith.subf %0, %2 : vector<128x30xf32>
    %c0_3 = arith.constant 0 : index
    %c0_4 = arith.constant 0 : index
    %4 = vector.load %arg3[%c0_3, %c0_4] : memref<1x30xf32, #tpu.memory_space<vmem>>, vector<1x30xf32>
    %5 = vector.broadcast %4 : vector<1x30xf32> to vector<128x30xf32>
    %6 = arith.mulf %3, %5 : vector<128x30xf32>
    %cst = arith.constant -5.000000e+00 : f32
    %cst_5 = arith.constant 5.000000e+00 : f32
    %7 = vector.broadcast %cst : f32 to vector<128x30xf32>
    %8 = arith.maximumf %7, %6 : vector<128x30xf32>
    %9 = vector.broadcast %cst_5 : f32 to vector<128x30xf32>
    %10 = arith.minimumf %9, %8 : vector<128x30xf32>
    %c0_6 = arith.constant 0 : index
    %c0_7 = arith.constant 0 : index
    %11 = vector.load %arg4[%c0_6, %c0_7] : memref<64x30xf32, #tpu.memory_space<vmem>>, vector<64x30xf32>
    %cst_8 = arith.constant dense<0.000000e+00> : vector<64x128xf32>
    %12 = tpu.matmul %11, %10, %cst_8 {dimension_numbers = #tpu.dot_dimension_numbers<[1], [1], [0], [0], [0, 0, 1, 0], [], []>} : vector<64x30xf32>, vector<128x30xf32>, vector<64x128xf32> -> vector<64x128xf32>
    %c0_9 = arith.constant 0 : index
    %c0_10 = arith.constant 0 : index
    %13 = vector.load %arg5[%c0_9, %c0_10] : memref<64x1xf32, #tpu.memory_space<vmem>>, vector<64x1xf32>
    %14 = vector.broadcast %13 : vector<64x1xf32> to vector<64x128xf32>
    %15 = arith.addf %12, %14 : vector<64x128xf32>
    %16 = math.tanh %15 : vector<64x128xf32>
    %c0_11 = arith.constant 0 : index
    %c0_12 = arith.constant 0 : index
    %17 = vector.load %arg6[%c0_11, %c0_12] : memref<64x64xf32, #tpu.memory_space<vmem>>, vector<64x64xf32>
    %cst_13 = arith.constant dense<0.000000e+00> : vector<64x128xf32>
    %18 = tpu.matmul %17, %16, %cst_13 {dimension_numbers = #tpu.dot_dimension_numbers<[1], [0], [0], [1], [0, 0, 1, 1], [], []>} : vector<64x64xf32>, vector<64x128xf32>, vector<64x128xf32> -> vector<64x128xf32>
    %c0_14 = arith.constant 0 : index
    %c0_15 = arith.constant 0 : index
    %19 = vector.load %arg7[%c0_14, %c0_15] : memref<64x1xf32, #tpu.memory_space<vmem>>, vector<64x1xf32>
    %20 = vector.broadcast %19 : vector<64x1xf32> to vector<64x128xf32>
    %21 = arith.addf %18, %20 : vector<64x128xf32>
    %22 = math.tanh %21 : vector<64x128xf32>
    %c0_16 = arith.constant 0 : index
    %c0_17 = arith.constant 0 : index
    %23 = vector.load %arg8[%c0_16, %c0_17] : memref<64x1xf32, #tpu.memory_space<vmem>>, vector<64x1xf32>
    %24 = vector.broadcast %23 : vector<64x1xf32> to vector<64x128xf32>
    %25 = arith.mulf %22, %24 : vector<64x128xf32>
    %cst_18 = arith.constant dense<0.000000e+00> : vector<128xf32>
    %26 = vector.multi_reduction <add>, %25, %cst_18 [0] : vector<64x128xf32> to vector<128xf32>
    %27 = vector.shape_cast %26 : vector<128xf32> to vector<1x128xf32>
    %c0_19 = arith.constant 0 : index
    %c0_20 = arith.constant 0 : index
    %28 = vector.load %arg9[%c0_19, %c0_20] : memref<1x1xf32, #tpu.memory_space<vmem>>, vector<1x1xf32>
    %29 = vector.broadcast %28 : vector<1x1xf32> to vector<1x128xf32>
    %30 = arith.addf %27, %29 : vector<1x128xf32>
    %c0_21 = arith.constant 0 : index
    %c0_22 = arith.constant 0 : index
    %c0_23 = arith.constant 0 : index
    %31 = vector.load %arg10[%c0_21, %c0_22, %c0_23] : memref<1x1x128xf32, #tpu.memory_space<vmem>>, vector<1x1x128xf32>
    %32 = vector.shape_cast %31 : vector<1x1x128xf32> to vector<1x128xf32>
    %33 = vector.shape_cast %30 : vector<1x128xf32> to vector<1x1x128xf32>
    tpu.vector_store %arg10[%c0_21, %c0_22, %c0_23], %33 {strides = array<i32>} : memref<1x1x128xf32, #tpu.memory_space<vmem>>, vector<1x1x128xf32>,
    return
  }
  func.func @transform_0(%arg0: i32) -> (i32, i32) {
    %c0_i32 = arith.constant 0 : i32
    %c0_i32_0 = arith.constant 0 : i32
    return %arg0, %c0_i32 : i32, i32
  }
  func.func @transform_1(%arg0: i32) -> (i32, i32) {
    %c0_i32 = arith.constant 0 : i32
    %c0_i32_0 = arith.constant 0 : i32
    %c0_i32_1 = arith.constant 0 : i32
    return %c0_i32, %c0_i32_0 : i32, i32
  }
  func.func @transform_2(%arg0: i32) -> (i32, i32) {
    %c0_i32 = arith.constant 0 : i32
    %c0_i32_0 = arith.constant 0 : i32
    %c0_i32_1 = arith.constant 0 : i32
    return %c0_i32, %c0_i32_0 : i32, i32
  }
  func.func @transform_3(%arg0: i32) -> (i32, i32) {
    %c0_i32 = arith.constant 0 : i32
    %c0_i32_0 = arith.constant 0 : i32
    %c0_i32_1 = arith.constant 0 : i32
    return %c0_i32, %c0_i32_0 : i32, i32
  }
  func.func @transform_4(%arg0: i32) -> (i32, i32) {
    %c0_i32 = arith.constant 0 : i32
    %c0_i32_0 = arith.constant 0 : i32
    %c0_i32_1 = arith.constant 0 : i32
    return %c0_i32, %c0_i32_0 : i32, i32
  }
  func.func @transform_5(%arg0: i32) -> (i32, i32) {
    %c0_i32 = arith.constant 0 : i32
    %c0_i32_0 = arith.constant 0 : i32
    %c0_i32_1 = arith.constant 0 : i32
    return %c0_i32, %c0_i32_0 : i32, i32
  }
  func.func @transform_6(%arg0: i32) -> (i32, i32) {
    %c0_i32 = arith.constant 0 : i32
    %c0_i32_0 = arith.constant 0 : i32
    %c0_i32_1 = arith.constant 0 : i32
    return %c0_i32, %c0_i32_0 : i32, i32
  }
  func.func @transform_7(%arg0: i32) -> (i32, i32) {
    %c0_i32 = arith.constant 0 : i32
    %c0_i32_0 = arith.constant 0 : i32
    %c0_i32_1 = arith.constant 0 : i32
    return %c0_i32, %c0_i32_0 : i32, i32
  }
  func.func @transform_8(%arg0: i32) -> (i32, i32) {
    %c0_i32 = arith.constant 0 : i32
    %c0_i32_0 = arith.constant 0 : i32
    %c0_i32_1 = arith.constant 0 : i32
    return %c0_i32, %c0_i32_0 : i32, i32
  }
  func.func @transform_9(%arg0: i32) -> (i32, i32, i32) {
    %c0_i32 = arith.constant 0 : i32
    %c0_i32_0 = arith.constant 0 : i32
    %c0_i32_1 = arith.constant 0 : i32
    return %arg0, %c0_i32, %c0_i32_0 : i32, i32, i32
  }
}

</mosaic_0001>

<bundles_post_ra>
// kernel: evo_bipedalwalker_value.1
= control target key start
LH: loop header
LB: loop body
LE: loop exit
PB: predicated region body
PF: predicated region fallthrough
CT: control target
= control target key end

     0   :  { %s1215_s0 = inlined_call_operand.vmem [shape: f32[128,30], index: 0, kind: input, shape index: {}]   ;;  %s1216_s1 = inlined_call_operand.vmem [shape: f32[1,30], index: 1, kind: input, shape index: {}]   ;;  %s1217_s2 = inlined_call_operand.vmem [shape: f32[1,30], index: 2, kind: input, shape index: {}]   ;;  %s1218_s3 = inlined_call_operand.hbm [shape: f32[64,30], index: 3, kind: input, shape index: {}]   ;;  %s1219_s4 = inlined_call_operand.hbm [shape: f32[64,1], index: 4, kind: input, shape index: {}]   ;;  %s1220_s5 = inlined_call_operand.hbm [shape: f32[64,64], index: 5, kind: input, shape index: {}]   ;;  %s1221_s6 = inlined_call_operand.vmem [shape: f32[64,1], index: 6, kind: input, shape index: {}]   ;;  %s1222_s7 = inlined_call_operand.vmem [shape: f32[64,1], index: 7, kind: input, shape index: {}]   ;;  %s1223_s8 = inlined_call_operand.<no memory space> [shape: f32[1,1], index: 8, kind: input, shape index: {}]   ;;  %s1224_s9 = inlined_call_operand.vmem [shape: f32[1,1,128], index: 9, kind: output, shape index: {}]  }
   0x1   :  { %v14_v0 = vstv %s1223_s8 }
   0x2   :  { %15 = vst [vmem:[#allocation2] sm:$0x1] %v14_v0 }
   0x3   :  { %16 = vsyncpa [#allocation4], 0 }
   0x4   :  { %17 = vsyncpa [#allocation6], 0  ;;  %s958_s11 = smov [#allocation5]   ;;  %s959_s13 = smov [#allocation3]  }
   0x5   :  { %s41_s12 = sshll.u32 %s958_s11, 4  ;;  %s29_s14 = sshll.u32 %s959_s13, 4  ;;  %s42_s12 = int_to_ptr.vmem [resolvable:$true] %s41_s12  ;;  %s30_s14 = int_to_ptr.vmem [resolvable:$true] %s29_s14 }
   0x6   :  { %s902_s15 = scalar_lea.vmem %s42_s12, 1024  ;;  %p907_p1 = scmp.lt.s32.totalorder %s42_s12, %s42_s12 }
   0x7   :  { %p903_p0 = scmp.ne.s32.totalorder %s42_s12, %s902_s15  ;;  %p908_p2 = scmp.lt.s32.totalorder %s902_s15, %s902_s15 }
   0x9   :  { %p909_p3 = por %p908_p2, %p907_p1 }
   0xb   :  { %p910_p4 = pnand %p909_p3, %p903_p0 }
   0xd   :  { %913 = shalt.err (!%p910_p4)
}
   0xe   :  { %s960_s16 = smov 128   ;;  %s961_s17 = smov 8  }
   0xf   :  { %47 = dma.hbm_to_vmem [thread:$0]  %s1219_s4, 1024, %s42_s12, [#allocation6], %s960_s16, %s960_s16, %s961_s17  }
  0x10   :  { %s922_s19 = scalar_lea.vmem %s30_s14, 1024  ;;  %p927_p6 = scmp.lt.s32.totalorder %s30_s14, %s30_s14 }
  0x11   :  { %p923_p5 = scmp.ne.s32.totalorder %s30_s14, %s922_s19  ;;  %p928_p7 = scmp.lt.s32.totalorder %s922_s19, %s922_s19 }
  0x13   :  { %p929_p8 = por %p928_p7, %p927_p6 }
  0x15   :  { %p930_p9 = pnand %p929_p8, %p923_p5 }
  0x17   :  { %933 = shalt.err (!%p930_p9)
}
  0x18   :  { %35 = dma.hbm_to_vmem [thread:$0]  %s1218_s3, 1024, %s30_s14, [#allocation4], %s960_s16, %s960_s16, %s961_s17  }
  0x19   :  { %s962_s22 = smov [#allocation7]  }
  0x1a   :  { %s53_s23 = sshll.u32 %s962_s22, 4  ;;  %s54_s23 = int_to_ptr.vmem [resolvable:$true] %s53_s23 }
  0x1b   :  { %s942_s24 = scalar_lea.vmem %s54_s23, 1024  ;;  %p947_p11 = scmp.lt.s32.totalorder %s54_s23, %s54_s23 }
  0x1c   :  { %p943_p10 = scmp.ne.s32.totalorder %s54_s23, %s942_s24  ;;  %p948_p12 = scmp.lt.s32.totalorder %s942_s24, %s942_s24 }
  0x1e   :  { %p949_p13 = por %p948_p12, %p947_p11 }
  0x20   :  { %p950_p0 = pnand %p949_p13, %p943_p10 }
  0x22   :  { %953 = shalt.err (!%p950_p0)
}
  0x23   :  { %59 = dma.hbm_to_vmem [thread:$0]  %s1220_s5, 1024, %s54_s23, [#allocation6], %s960_s16, %s960_s16, %s961_s17  }
  0x24   :  { %954 = dma.done.wait [#allocation4], 1024  }
  0x25   :  { %955 = vsyncadd [#allocation4], 4294966272 }
  0x26   :  { %956 = dma.done.wait [#allocation6], 2048  }
  0x27   :  { %957 = vsyncadd [#allocation6], 4294965248  ;;  %v963_v1 = vmov 0   ;;  %v90_v2 = vld [vmem:[%s1215_s0 + $0x78] sm:$0xff]  ;;  %v1032_v3 = vld [vmem:[%s1216_s1] ss:$0 sm:$0xff] }
  0x28   :  { %860 = vset.pattern.permute.xlu0 %v963_v1  ;;  %861 = vset.pattern.permute.xlu1 %v963_v1  ;;  %v1037_v4 = vld [vmem:[%s1217_s2] ss:$0 sm:$0xff]  ;;  %v113_v5 = vsub.f32 %v90_v2, %v1032_v3  ;;  %v89_v6 = vld [vmem:[%s1215_s0 + $0x70] sm:$0xff]  ;;  %v88_v7 = vld [vmem:[%s1215_s0 + $0x68] sm:$0xff]  ;;  %vm225_vm0 = vcmask 244736   ;;  %vm467_vm1 = vcmask 523264  }
  0x29   :  { %v112_v8 = vsub.f32 %v89_v6, %v1032_v3  ;;  %v111_v9 = vsub.f32 %v88_v7, %v1032_v3  ;;  %v87_v10 = vld [vmem:[%s1215_s0 + $0x60] sm:$0xff]  ;;  %v86_v17 = vld [vmem:[%s1215_s0 + $0x58] sm:$0xff]  ;;  %v182_v23 = vld [vmem:[#allocation5 + $0x28] sm:$0xff] }
  0x2a   :  { %v136_v11 = vmul.f32 %v1037_v4, %v113_v5  ;;  %v110_v15 = vsub.f32 %v87_v10, %v1032_v3  ;;  %v169_v18 = vld [vmem:[#allocation3] sm:$0xff]  ;;  %v184_v19 = vld [vmem:[#allocation5 + $0x38] sm:$0xff]  ;;  %v109_v22 = vsub.f32 %v86_v17, %v1032_v3  ;;  %v85_v24 = vld [vmem:[%s1215_s0 + $0x50] sm:$0xff]  ;;  %212 = vperm.xlu1 %861, %v182_v23  }
  0x2b   :  { %v135_v12 = vmul.f32 %v1037_v4, %v112_v8  ;;  %v134_v14 = vmul.f32 %v1037_v4, %v111_v9  ;;  %814 = vmatprep.mubr.msk.f32.mxu0 %vm225_vm0, %v169_v18  ;;  %222 = vperm.xlu0 %860, %v184_v19   ;;  %v183_v25 = vld [vmem:[#allocation5 + $0x30] sm:$0xff]  ;;  %v181_v26 = vld [vmem:[#allocation5 + $0x20] sm:$0xff]  ;;  %v108_v29 = vsub.f32 %v85_v24, %v1032_v3  ;;  %v180_v31 = vld [vmem:[#allocation5 + $0x18] sm:$0xff] }
  0x2c   :  { %v709_v13 = vclamps-f32 %v136_v11, 5.0  ;;  %v133_v21 = vmul.f32 %v1037_v4, %v110_v15  ;;  %v132_v28 = vmul.f32 %v1037_v4, %v109_v22  ;;  %v84_v30 = vld [vmem:[%s1215_s0 + $0x48] sm:$0xff]  ;;  %v179_v32 = vld [vmem:[#allocation5 + $0x10] sm:$0xff]  ;;  %v83_v36 = vld [vmem:[%s1215_s0 + $0x40] sm:$0xff] }
  0x2d   :  { %v708_v16 = vclamps-f32 %v135_v12, 5.0  ;;  %v707_v20 = vclamps-f32 %v134_v14, 5.0  ;;  %v131_v34 = vmul.f32 %v1037_v4, %v108_v29  ;;  %v107_v35 = vsub.f32 %v84_v30, %v1032_v3  ;;  %v178_v37 = vld [vmem:[#allocation5 + $0x8] sm:$0xff]  ;;  %v177_v38 = vld [vmem:[#allocation5] sm:$0xff]  ;;  %v82_v42 = vld [vmem:[%s1215_s0 + $0x38] sm:$0xff] }
  0x2e   :  { %782 = vmatprep.subr.msk.mxu0 %vm225_vm0, %v709_v13  ;;  %v706_v27 = vclamps-f32 %v133_v21, 5.0  ;;  %207 = vperm.xlu1 %861, %v181_v26   ;;  %v705_v33 = vclamps-f32 %v132_v28, 5.0  ;;  %v106_v41 = vsub.f32 %v83_v36, %v1032_v3  ;;  %v419_v43 = vld [vmem:[%s1221_s6] sm:$0xff]  ;;  %v420_v44 = vld [vmem:[%s1221_s6 + $0x8] sm:$0xff]  ;;  %v105_v47 = vsub.f32 %v82_v42, %v1032_v3  ;;  %v81_v48 = vld [vmem:[%s1215_s0 + $0x30] sm:$0xff] }
  0x2f   :  { %783 = vmatpush3.xpose.msk.msra.mxu0 %vm225_vm0, %v709_v13  ;;  %217 = vperm.xlu0 %860, %v183_v25   ;;  %v704_v39 = vclamps-f32 %v131_v34, 5.0  ;;  %v130_v40 = vmul.f32 %v1037_v4, %v107_v35  ;;  %v421_v49 = vld [vmem:[%s1221_s6 + $0x10] sm:$0xff]  ;;  %v422_v50 = vld [vmem:[%s1221_s6 + $0x18] sm:$0xff]  ;;  %v104_v53 = vsub.f32 %v81_v48, %v1032_v3  ;;  %v80_v54 = vld [vmem:[%s1215_s0 + $0x28] sm:$0xff] }
  0x30   :  { %784 = vmatprep.subr.msk.mxu0 %vm225_vm0, %v708_v16  ;;  %v129_v46 = vmul.f32 %v1037_v4, %v106_v41  ;;  %v128_v52 = vmul.f32 %v1037_v4, %v105_v47  ;;  %v423_v55 = vld [vmem:[%s1221_s6 + $0x20] sm:$0xff]  ;;  %v424_v56 = vld [vmem:[%s1221_s6 + $0x28] sm:$0xff]  ;;  %v103_v59 = vsub.f32 %v80_v54, %v1032_v3  ;;  %v425_v61 = vld [vmem:[%s1221_s6 + $0x30] sm:$0xff] }
  0x31   :  { %v703_v45 = vclamps-f32 %v130_v40, 5.0  ;;  %v127_v58 = vmul.f32 %v1037_v4, %v104_v53  ;;  %v79_v60 = vld [vmem:[%s1215_s0 + $0x20] sm:$0xff]  ;;  %v426_v62 = vld [vmem:[%s1221_s6 + $0x38] sm:$0xff]  ;;  %v606_v6 = vld [vmem:[%s1222_s7 + $0x8] sm:$0xff] }
  0x32   :  { %197 = vperm.xlu1 %861, %v179_v32   ;;  %v702_v51 = vclamps-f32 %v129_v46, 5.0  ;;  %v701_v57 = vclamps-f32 %v128_v52, 5.0  ;;  %v126_v0 = vmul.f32 %v1037_v4, %v103_v59  ;;  %v102_v1 = vsub.f32 %v79_v60, %v1032_v3  ;;  %v78_v2 = vld [vmem:[%s1215_s0 + $0x18] sm:$0xff]  ;;  %v605_v5 = vld [vmem:[%s1222_s7] sm:$0xff]  ;;  %v77_v10 = vld [vmem:[%s1215_s0 + $0x10] sm:$0xff] }
  0x33   :  { %785 = vmatpush3.xpose.msk.msra.mxu0 %vm225_vm0, %v708_v16  ;;  %202 = vperm.xlu0 %860, %v180_v31   ;;  %v700_v63 = vclamps-f32 %v127_v58, 5.0  ;;  %v101_v9 = vsub.f32 %v78_v2, %v1032_v3  ;;  %v607_v11 = vld [vmem:[%s1222_s7 + $0x10] sm:$0xff]  ;;  %v608_v12 = vld [vmem:[%s1222_s7 + $0x18] sm:$0xff]  ;;  %v100_v15 = vsub.f32 %v77_v10, %v1032_v3  ;;  %v76_v16 = vld [vmem:[%s1215_s0 + $0x8] sm:$0xff] }
  0x34   :  { %786 = vmatprep.subr.msk.mxu0 %vm225_vm0, %v707_v20  ;;  %v699_v7 = vclamps-f32 %v126_v0, 5.0  ;;  %v125_v8 = vmul.f32 %v1037_v4, %v102_v1  ;;  %v609_v17 = vld [vmem:[%s1222_s7 + $0x20] sm:$0xff]  ;;  %v610_v18 = vld [vmem:[%s1222_s7 + $0x28] sm:$0xff]  ;;  %v99_v21 = vsub.f32 %v76_v16, %v1032_v3  ;;  %v611_v23 = vld [vmem:[%s1222_s7 + $0x30] sm:$0xff] }
  0x35   :  { %v124_v14 = vmul.f32 %v1037_v4, %v101_v9  ;;  %v75_v22 = vld [vmem:[%s1215_s0] sm:$0xff]  ;;  %v612_v24 = vld [vmem:[%s1222_s7 + $0x38] sm:$0xff]  ;;  %v174_v34 = vld [vmem:[#allocation3 + $0x28] sm:$0xff] }
  0x36   :  { %187 = vperm.xlu1 %861, %v177_v38   ;;  %v698_v13 = vclamps-f32 %v125_v8, 5.0  ;;  %v122_v26 = vmul.f32 %v1037_v4, %v99_v21  ;;  %v674_v28 = vld [vmem:[#allocation2] sm:$0x1]  ;;  %v171_v32 = vld [vmem:[#allocation3 + $0x10] sm:$0xff]  ;;  %v412_v8 = vld [vmem:[#allocation7 + $0x8] sm:$0xff] }
  0x37   :  { %787 = vmatpush3.xpose.msk.msra.mxu0 %vm225_vm0, %v707_v20  ;;  %192 = vperm.xlu0 %860, %v178_v37   ;;  %v697_v19 = vclamps-f32 %v124_v14, 5.0  ;;  %v123_v20 = vmul.f32 %v1037_v4, %v100_v15  ;;  %v175_v35 = vld [vmem:[#allocation3 + $0x30] sm:$0xff]  ;;  %v176_v36 = vld [vmem:[#allocation3 + $0x38] sm:$0xff]  ;;  %v411_v37 = vld [vmem:[#allocation7] sm:$0xff] }
  0x38   :  { %788 = vmatprep.subr.msk.mxu0 %vm225_vm0, %v706_v27  ;;  %v695_v29 = vclamps-f32 %v122_v26, 5.0  ;;  %842 = vmatprep.mubr.msk.f32.mxu1 %vm467_vm1, %v411_v37  ;;  %v413_v9 = vld [vmem:[#allocation7 + $0x10] sm:$0xff]  ;;  %v414_v10 = vld [vmem:[#allocation7 + $0x18] sm:$0xff] }
  0x39   :  { %v696_v25 = vclamps-f32 %v123_v20, 5.0  ;;  %v418_v14 = vld [vmem:[#allocation7 + $0x38] sm:$0xff] }
  0x3a   :  { %434 = vperm.xlu1 %861, %v420_v44  }
  0x3b   :  { %789 = vmatpush3.xpose.msk.msra.mxu0 %vm225_vm0, %v706_v27  ;;  %429 = vperm.xlu0 %860, %v419_v43   ;;  %v98_v27 = vsub.f32 %v75_v22, %v1032_v3  ;;  %v170_v3 = vld [vmem:[#allocation3 + $0x8] sm:$0xff] }
  0x3c   :  { %790 = vmatprep.subr.msk.mxu0 %vm225_vm0, %v705_v33 }
  0x3d   :  { %v121_v30 = vmul.f32 %v1037_v4, %v98_v27  ;;  %v173_v4 = vld [vmem:[#allocation3 + $0x20] sm:$0xff] }
  0x3e   :  { %444 = vperm.xlu1 %861, %v422_v50  }
  0x3f   :  { %791 = vmatpush3.xpose.msk.msra.mxu0 %vm225_vm0, %v705_v33  ;;  %439 = vperm.xlu0 %860, %v421_v49   ;;  %v694_v31 = vclamps-f32 %v121_v30, 5.0  ;;  %v172_v33 = vld [vmem:[#allocation3 + $0x18] sm:$0xff] }
  0x40   :  { %792 = vmatprep.subr.msk.mxu0 %vm225_vm0, %v704_v39 }
  0x42   :  { %454 = vperm.xlu1 %861, %v424_v56  }
  0x43   :  { %793 = vmatpush3.xpose.msk.msra.mxu0 %vm225_vm0, %v704_v39  ;;  %449 = vperm.xlu0 %860, %v423_v55  }
  0x44   :  { %794 = vmatprep.subr.msk.mxu0 %vm225_vm0, %v703_v45 }
  0x46   :  { %464 = vperm.xlu1 %861, %v426_v62  }
  0x47   :  { %795 = vmatpush3.xpose.msk.msra.mxu0 %vm225_vm0, %v703_v45  ;;  %459 = vperm.xlu0 %860, %v425_v61  }
  0x48   :  { %796 = vmatprep.subr.msk.mxu0 %vm225_vm0, %v702_v51 }
  0x4a   :  { %620 = vperm.xlu1 %861, %v606_v6  }
  0x4b   :  { %797 = vmatpush3.xpose.msk.msra.mxu0 %vm225_vm0, %v702_v51  ;;  %615 = vperm.xlu0 %860, %v605_v5  }
  0x4c   :  { %798 = vmatprep.subr.msk.mxu0 %vm225_vm0, %v701_v57 }
  0x4e   :  { %630 = vperm.xlu1 %861, %v608_v12   ;;  %v416_v12 = vld [vmem:[#allocation7 + $0x28] sm:$0xff] }
  0x4f   :  { %799 = vmatpush3.xpose.msk.msra.mxu0 %vm225_vm0, %v701_v57  ;;  %625 = vperm.xlu0 %860, %v607_v11   ;;  %v415_v11 = vld [vmem:[#allocation7 + $0x20] sm:$0xff] }
  0x50   :  { %800 = vmatprep.subr.msk.mxu0 %vm225_vm0, %v700_v63 }
  0x52   :  { %640 = vperm.xlu1 %861, %v610_v18  }
  0x53   :  { %801 = vmatpush3.xpose.msk.msra.mxu0 %vm225_vm0, %v700_v63  ;;  %635 = vperm.xlu0 %860, %v609_v17  }
  0x54   :  { %802 = vmatprep.subr.msk.mxu0 %vm225_vm0, %v699_v7 }
  0x56   :  { %650 = vperm.xlu1 %861, %v612_v24  }
  0x57   :  { %803 = vmatpush3.xpose.msk.msra.mxu0 %vm225_vm0, %v699_v7  ;;  %645 = vperm.xlu0 %860, %v611_v23  }
  0x58   :  { %804 = vmatprep.subr.msk.mxu0 %vm225_vm0, %v698_v13 }
  0x5b   :  { %805 = vmatpush3.xpose.msk.msra.mxu0 %vm225_vm0, %v698_v13  ;;  %677 = vperm.xlu0 %860, %v674_v28   ;;  %v417_v13 = vld [vmem:[#allocation7 + $0x30] sm:$0xff] }
  0x5c   :  { %806 = vmatprep.subr.msk.mxu0 %vm225_vm0, %v697_v19 }
  0x5f   :  { %807 = vmatpush3.xpose.msk.msra.mxu0 %vm225_vm0, %v697_v19 }
  0x60   :  { %808 = vmatprep.subr.msk.mxu0 %vm225_vm0, %v696_v25 }
  0x63   :  { %809 = vmatpush3.xpose.msk.msra.mxu0 %vm225_vm0, %v696_v25 }
  0x64   :  { %810 = vmatprep.subr.msk.mxu0 %vm225_vm0, %v695_v29 }
  0x67   :  { %811 = vmatpush3.xpose.msk.msra.mxu0 %vm225_vm0, %v695_v29 }
  0x68   :  { %812 = vmatprep.subr.msk.mxu0 %vm225_vm0, %v694_v31 }
  0x6b   :  { %813 = vmatpush3.xpose.msk.msra.mxu0 %vm225_vm0, %v694_v31 }
  0x6e   :  { %815 = vmatmul.mubr.msk.f32.vlgmr.msra.gmra.mxu0 %vm225_vm0, %v170_v3 }
  0x6f   :  { %817 = vmatprep.mubr.msk.f32.mxu0 %vm225_vm0, %v171_v32 }
  0x72   :  { %818 = vmatmul.mubr.msk.f32.gmra.mxu0 %vm225_vm0, %v172_v33 }
  0x73   :  { %820 = vmatprep.mubr.msk.f32.mxu0 %vm225_vm0, %v173_v4 }
  0x76   :  { %821 = vmatmul.mubr.msk.f32.gmra.mxu0 %vm225_vm0, %v174_v34 }
  0x77   :  { %823 = vmatprep.mubr.msk.f32.mxu0 %vm225_vm0, %v175_v35 }
  0x7a   :  { %824 = vmatmul.mubr.msk.f32.gmra.mxu0 %vm225_vm0, %v176_v36 }
  0xa5   :  { %v213_v42 = vpop.permute.xlu1 %212 }
  0xa6   :  { %v223_v40 = vpop.permute.xlu0 %222 }
  0xa9   :  { %v208_v47 = vpop.permute.xlu1 %207 }
  0xaa   :  { %v218_v45 = vpop.permute.xlu0 %217 }
  0xad   :  { %v198_v55 = vpop.permute.xlu1 %197 }
  0xae   :  { %v203_v53 = vpop.permute.xlu0 %202 }
  0xb1   :  { %v188_v60 = vpop.permute.xlu1 %187 }
  0xb2   :  { %v193_v58 = vpop.permute.xlu0 %192 }
  0xb5   :  { %v435_v16 = vpop.permute.xlu1 %434 }
  0xb6   :  { %v430_v15 = vpop.permute.xlu0 %429 }
  0xb9   :  { %v445_v18 = vpop.permute.xlu1 %444 }
  0xba   :  { %v440_v17 = vpop.permute.xlu0 %439 }
  0xbd   :  { %v455_v22 = vpop.permute.xlu1 %454 }
  0xbe   :  { %v450_v19 = vpop.permute.xlu0 %449 }
  0xc1   :  { %v465_v30 = vpop.permute.xlu1 %464 }
  0xc2   :  { %v460_v27 = vpop.permute.xlu0 %459 }
  0xc5   :  { %v621_v36 = vpop.permute.xlu1 %620 }
  0xc6   :  { %v616_v4 = vpop.permute.xlu0 %615 }
 0x12e   :  { %v816_v38 = vpop.f32.mrf.mxu0 }
 0x12f   :  { %v370_v59 = vadd.f32 %v816_v38, %v193_v58 }
 0x130   :  { %v364_v39 = vpop.f32.mrf.mxu0 }
 0x131   :  { %v365_v61 = vadd.f32 %v364_v39, %v188_v60 }
 0x132   :  { %v819_v41 = vpop.f32.mrf.mxu0 }
 0x133   :  { %v380_v56 = vadd.f32 %v819_v41, %v203_v53  ;;  %v626_v41 = vpop.permute.xlu0 %625 }
 0x134   :  { %v374_v43 = vpop.f32.mrf.mxu0 }
 0x135   :  { %v375_v57 = vadd.f32 %v374_v43, %v198_v55  ;;  %v631_v43 = vpop.permute.xlu1 %630 }
 0x136   :  { %v822_v44 = vpop.f32.mrf.mxu0 }
 0x137   :  { %v390_v51 = vadd.f32 %v822_v44, %v213_v42 }
 0x138   :  { %v384_v46 = vpop.f32.mrf.mxu0 }
 0x139   :  { %v385_v54 = vadd.f32 %v384_v46, %v208_v47 }
 0x13a   :  { %v825_v48 = vpop.f32.mrf.mxu0 }
 0x13b   :  { %v400_v49 = vadd.f32 %v825_v48, %v223_v40 }
 0x13c   :  { %v394_v50 = vpop.f32.mrf.mxu0 }
 0x13d   :  { %862 = vtanh.f32 %v400_v49  ;;  %v395_v52 = vadd.f32 %v394_v50, %v218_v45  ;;  %v636_v49 = vpop.permute.xlu0 %635 }
 0x13f   :  { %864 = vtanh.f32 %v395_v52 }
 0x140   :  { %866 = vtanh.f32 %v390_v51 }
 0x141   :  { %868 = vtanh.f32 %v385_v54  ;;  %v641_v54 = vpop.permute.xlu1 %640 }
 0x142   :  { %870 = vtanh.f32 %v380_v56 }
 0x143   :  { %872 = vtanh.f32 %v375_v57 }
 0x144   :  { %874 = vtanh.f32 %v370_v59 }
 0x145   :  { %876 = vtanh.f32 %v365_v61  ;;  %v646_v61 = vpop.permute.xlu0 %645 }
 0x14a   :  { %v863_v62 = vpop.eup %862 }
 0x14b   :  { %826 = vmatprep.subr.mxu1 %v863_v62 }
 0x14c   :  { %v865_v63 = vpop.eup %864  ;;  %827 = vmatpush3.msra.mxu1 %v863_v62 }
 0x14d   :  { %828 = vmatprep.subr.mxu1 %v865_v63  ;;  %v867_v0 = vpop.eup %866 }
 0x14e   :  { %829 = vmatpush3.msra.mxu1 %v865_v63  ;;  %v869_v1 = vpop.eup %868 }
 0x14f   :  { %830 = vmatprep.subr.mxu1 %v867_v0  ;;  %v871_v2 = vpop.eup %870 }
 0x150   :  { %831 = vmatpush3.msra.mxu1 %v867_v0  ;;  %v873_v5 = vpop.eup %872  ;;  %v651_v0 = vpop.permute.xlu1 %650 }
 0x151   :  { %832 = vmatprep.subr.mxu1 %v869_v1  ;;  %v875_v6 = vpop.eup %874 }
 0x152   :  { %833 = vmatpush3.msra.mxu1 %v869_v1  ;;  %v877_v7 = vpop.eup %876 }
 0x153   :  { %834 = vmatprep.subr.mxu1 %v871_v2 }
 0x154   :  { %835 = vmatpush3.msra.mxu1 %v871_v2 }
 0x155   :  { %836 = vmatprep.subr.mxu1 %v873_v5 }
 0x156   :  { %837 = vmatpush3.msra.mxu1 %v873_v5  ;;  %v680_v5 = vlaneseq }
 0x157   :  { %838 = vmatprep.subr.mxu1 %v875_v6 }
 0x158   :  { %839 = vmatpush3.msra.mxu1 %v875_v6 }
 0x159   :  { %840 = vmatprep.subr.mxu1 %v877_v7 }
 0x15a   :  { %841 = vmatpush3.msra.mxu1 %v877_v7 }
 0x15b   :  { %843 = vmatmul.mubr.msk.f32.vlgmr.msra.gmra.mxu1 %vm467_vm1, %v412_v8  ;;  %v681_v8 = vshrl.u32 %v680_v5, 7 }
 0x15c   :  { %845 = vmatprep.mubr.msk.f32.mxu1 %vm467_vm1, %v413_v9 }
 0x15f   :  { %846 = vmatmul.mubr.msk.f32.gmra.mxu1 %vm467_vm1, %v414_v10 }
 0x160   :  { %848 = vmatprep.mubr.msk.f32.mxu1 %vm467_vm1, %v415_v11  ;;  %v682_v11 = vsub.s32 0, %v681_v8 }
 0x163   :  { %849 = vmatmul.mubr.msk.f32.gmra.mxu1 %vm467_vm1, %v416_v12 }
 0x164   :  { %851 = vmatprep.mubr.msk.f32.mxu1 %vm467_vm1, %v417_v13  ;;  %v678_v13 = vpop.permute.xlu0 %677 }
 0x167   :  { %852 = vmatmul.mubr.msk.f32.gmra.mxu1 %vm467_vm1, %v418_v14 }
 0x21b   :  { %v844_v20 = vpop.f32.mrf.mxu1 }
 0x21c   :  { %v564_v21 = vadd.f32 %v844_v20, %v435_v16 }
 0x21d   :  { %v558_v23 = vpop.f32.mrf.mxu1 }
 0x21e   :  { %v559_v24 = vadd.f32 %v558_v23, %v430_v15  ;;  %878 = vtanh.f32 %v564_v21  ;;  %v683_v15 = vrot.slane %v678_v13, %v682_v11 }
 0x21f   :  { %v847_v25 = vpop.f32.mrf.mxu1 }
 0x220   :  { %880 = vtanh.f32 %v559_v24  ;;  %v574_v26 = vadd.f32 %v847_v25, %v445_v18 }
 0x221   :  { %v568_v28 = vpop.f32.mrf.mxu1 }
 0x222   :  { %v569_v29 = vadd.f32 %v568_v28, %v440_v17  ;;  %882 = vtanh.f32 %v574_v26 }
 0x223   :  { %v850_v31 = vpop.f32.mrf.mxu1 }
 0x224   :  { %884 = vtanh.f32 %v569_v29  ;;  %v584_v3 = vadd.f32 %v850_v31, %v455_v22 }
 0x225   :  { %v578_v32 = vpop.f32.mrf.mxu1 }
 0x226   :  { %v579_v33 = vadd.f32 %v578_v32, %v450_v19  ;;  %886 = vtanh.f32 %v584_v3 }
 0x227   :  { %v853_v34 = vpop.f32.mrf.mxu1 }
 0x228   :  { %888 = vtanh.f32 %v579_v33  ;;  %v594_v35 = vadd.f32 %v853_v34, %v465_v30 }
 0x229   :  { %v588_v37 = vpop.f32.mrf.mxu1 }
 0x22a   :  { %v589_v38 = vadd.f32 %v588_v37, %v460_v27  ;;  %890 = vtanh.f32 %v594_v35 }
 0x22b   :  { %v879_v39 = vpop.eup %878 }
 0x22c   :  { %892 = vtanh.f32 %v589_v38  ;;  %v654_v45 = vmul.f32 %v879_v39, %v621_v36 }
 0x22d   :  { %v881_v40 = vpop.eup %880 }
 0x22e   :  { %v653_v42 = vmul.f32 %v881_v40, %v616_v4 }
 0x22f   :  { %v883_v44 = vpop.eup %882 }
 0x230   :  { %v661_v47 = vadd.f32 %v654_v45, %v653_v42  ;;  %v656_v51 = vmul.f32 %v883_v44, %v631_v43 }
 0x231   :  { %v885_v46 = vpop.eup %884 }
 0x232   :  { %v655_v48 = vmul.f32 %v885_v46, %v626_v41 }
 0x233   :  { %v887_v50 = vpop.eup %886 }
 0x234   :  { %v662_v52 = vadd.f32 %v661_v47, %v655_v48  ;;  %v658_v58 = vmul.f32 %v887_v50, %v641_v54 }
 0x235   :  { %v889_v53 = vpop.eup %888 }
 0x236   :  { %v657_v55 = vmul.f32 %v889_v53, %v636_v49  ;;  %v663_v56 = vadd.f32 %v662_v52, %v656_v51 }
 0x237   :  { %v891_v57 = vpop.eup %890 }
 0x238   :  { %v664_v59 = vadd.f32 %v663_v56, %v657_v55  ;;  %v660_v1 = vmul.f32 %v891_v57, %v651_v0 }
 0x239   :  { %v893_v60 = vpop.eup %892 }
 0x23a   :  { %v659_v62 = vmul.f32 %v893_v60, %v646_v61  ;;  %v665_v63 = vadd.f32 %v664_v59, %v658_v58 }
 0x23c   :  { %v666_v2 = vadd.f32 %v665_v63, %v659_v62 }
 0x23e   :  { %v667_v6 = vadd.f32 %v666_v2, %v660_v1 }
 0x240   :  { %v668_v7 = vrot.slane %v667_v6, 4 }
 0x242   :  { %v669_v9 = vadd.f32 %v668_v7, %v667_v6 }
 0x244   :  { %v670_v10 = vrot.slane %v669_v9, 2 }
 0x246   :  { %v671_v12 = vadd.f32 %v670_v10, %v669_v9 }
 0x248   :  { %v672_v14 = vrot.slane %v671_v12, 1 }
 0x24a   :  { %v673_v16 = vadd.f32 %v672_v14, %v671_v12 }
 0x24c   :  { %v684_v17 = vadd.f32 %v683_v15, %v673_v16 }
 0x24e   :  { %685 = vst [vmem:[%s1224_s9] sm:$0x1] %v684_v17 }
 0x24f   :  { %690 = vsyncpa [#allocation4], 1 }
 0x250   :  { %691 = vsyncpa [#allocation6], 1 }

</bundles_post_ra>
